<compile_context>
chip_gen: v7x
topology: tpu7x:2x2x1
jax: 0.10.0
libtpu: 0.0.40
codegen_flags: <defaults>
</compile_context>

<pallas_src>
import functools

import jax
import jax.numpy as jnp
from jax.experimental import pallas as pl
from jax.experimental.pallas import tpu as pltpu

_LANE = 128
_MAX_LANE_TILE = 2048   # 512+ lanes ~= 85% of HBM roofline; 2048 is the sweet spot
_ROW_TILE_CAP = 256     # flattened (N*C) rows per block; bounds VMEM independent of N*C


def _vmem_limit_bytes():
    """Scoped-VMEM limit per generation: ~64 MiB on v5e/v6e (128 MiB physical),
    ~48 MiB on v7x (64 MiB physical). Conservative fallback if the query fails."""
    try:
        cap = int(pltpu.get_tpu_info().vmem_capacity_bytes)
    except Exception:
        cap = 64 * 1024 * 1024
    return int(min((cap * 3) // 4, 64 * 1024 * 1024))


def _pick_lane_tile(L, row_bytes, budget, cap):
    """Full L if it is small enough (no tail masking), else the largest
    multiple-of-128 lane tile that fits the double-buffered budget."""
    if L <= cap and L * row_bytes <= budget:
        return L
    tl = (budget // max(row_bytes, 1)) // _LANE * _LANE
    tl = max(_LANE, min(tl, cap))
    return min(tl, max(_LANE, (L // _LANE) * _LANE))


# --------------------------- Pass 1: per-row stats ---------------------------
def _stats_kernel(x_ref, s1_ref, s2_ref, shift_ref, *, tl, L, num_lb):
    """Per-row (flattened n*c) shifted sum / sum-of-squares over the L axis.

    shift = first element of each row (captured at the first L block);
    accumulating (x - shift) avoids catastrophic cancellation of a raw
    E[x^2]-E[x]^2 variance. Only the tail L block pays the iota/where mask.
    """
    li = pl.program_id(1)

    @pl.when(li == 0)
    def _init():
        shift_ref[...] = x_ref[:, 0:1].astype(jnp.float32)
        s1_ref[...] = jnp.zeros_like(s1_ref)
        s2_ref[...] = jnp.zeros_like(s2_ref)

    def _accumulate(mask_tail):
        xs = x_ref[...].astype(jnp.float32) - shift_ref[...]
        if mask_tail:
            lane = jax.lax.broadcasted_iota(jnp.int32, xs.shape, dimension=1)
            xs = jnp.where(li * tl + lane < L, xs, 0.0)
        s1_ref[...] += jnp.sum(xs, axis=1, keepdims=True)
        s2_ref[...] += jnp.sum(xs * xs, axis=1, keepdims=True)

    if L % tl != 0:
        @pl.when(li < num_lb - 1)
        def _full_blocks():
            _accumulate(mask_tail=False)

        @pl.when(li == num_lb - 1)
        def _tail_block():
            _accumulate(mask_tail=True)
    else:
        _accumulate(mask_tail=False)


# --------------------------- Pass 2: fused apply -----------------------------
def _apply_kernel(x_ref, scale_ref, offset_ref, o_ref):
    """out = x * scale + offset  (scale/offset per flattened (n,c) row)."""
    x = x_ref[...].astype(jnp.float32)
    o_ref[...] = (x * scale_ref[...] + offset_ref[...]).astype(o_ref.dtype)


# ------------------- Fused single-pass kernel (small tensors) ----------------
def _fused_kernel(x_ref, bvar_ref, gamma_ref, beta_ref, o_ref, *, eps, L):
    x = x_ref[...].astype(jnp.float32)               # (N, C, L)
    N, C = x.shape[0], x.shape[1]

    shift = x[:, :, 0:1]                             # (N, C, 1)
    xs = x - shift
    s1 = jnp.sum(xs, axis=2, keepdims=True)          # (N, C, 1)
    s2 = jnp.sum(xs * xs, axis=2, keepdims=True)     # (N, C, 1)
    inv_l = 1.0 / L
    mean_r = shift + s1 * inv_l                      # per-(n, c) mean
    m2_r = jnp.maximum(s2 - s1 * s1 * inv_l, 0.0)    # per-(n, c) centered SSQ

    # BatchNorm stats (reduce over N): Chan-style combine of per-row stats.
    mean_c = jnp.mean(mean_r, axis=0, keepdims=True)                      # (1, C, 1)
    m2_c = (jnp.sum(m2_r, axis=0, keepdims=True)
            + L * jnp.sum((mean_r - mean_c) ** 2, axis=0, keepdims=True))
    rinv_c = jax.lax.rsqrt(m2_c / (N * L) + eps)
    # LayerNorm stats (reduce over C).
    mean_n = jnp.mean(mean_r, axis=1, keepdims=True)                      # (N, 1, 1)
    m2_n = (jnp.sum(m2_r, axis=1, keepdims=True)
            + L * jnp.sum((mean_r - mean_n) ** 2, axis=1, keepdims=True))
    rinv_n = jax.lax.rsqrt(m2_n / (C * L) + eps)

    b = bvar_ref[...].astype(jnp.float32).reshape(1, C, 1)
    g = gamma_ref[...].astype(jnp.float32).reshape(1, C, 1)
    be = beta_ref[...].astype(jnp.float32).reshape(1, C, 1)

    # out = g*(b*(x-mean_c)*rinv_c + (1-b)*(x-mean_n)*rinv_n) + be = x*scale + offset
    scale = g * (b * rinv_c + (1.0 - b) * rinv_n)                         # (N, C, 1)
    offset = be - g * (b * rinv_c * mean_c + (1.0 - b) * rinv_n * mean_n)
    o_ref[...] = (x * scale + offset).astype(o_ref.dtype)


# --------------------------------- wrappers ----------------------------------
def _fused(x, bcn_var, gamma, beta, eps, vmem_limit):
    N, C, H, W = x.shape
    L = H * W
    x3 = x.reshape(N, C, L)
    bvar2 = bcn_var.astype(jnp.float32).reshape(C, 1)
    g2 = gamma.astype(jnp.float32).reshape(C, 1)
    be2 = beta.astype(jnp.float32).reshape(C, 1)

    out = pl.pallas_call(
        functools.partial(_fused_kernel, eps=eps, L=L),
        out_shape=jax.ShapeDtypeStruct((N, C, L), x.dtype),
        grid=(1,),
        in_specs=[
            pl.BlockSpec((N, C, L), lambda i: (0, 0, 0)),
            pl.BlockSpec((C, 1), lambda i: (0, 0)),
            pl.BlockSpec((C, 1), lambda i: (0, 0)),
            pl.BlockSpec((C, 1), lambda i: (0, 0)),
        ],
        out_specs=pl.BlockSpec((N, C, L), lambda i: (0, 0, 0)),
        compiler_params=pltpu.CompilerParams(
            dimension_semantics=("arbitrary",),
            vmem_limit_bytes=vmem_limit),
    )(x3, bvar2, g2, be2)
    return out.reshape(N, C, H, W)


def _two_pass(x, bcn_var, gamma, beta, eps, vmem_limit, lane_cap):
    N, C, H, W = x.shape
    L = H * W
    NC = N * C
    x2 = x.reshape(NC, L)
    in_bytes = x.dtype.itemsize
    budget = int(vmem_limit * 0.6)   # double-buffered streaming footprint budget

    # ---------------- Pass 1: per-row shifted sums (one read of x) ----------------
    tm1 = NC if NC <= _ROW_TILE_CAP else _ROW_TILE_CAP
    tl1 = _pick_lane_tile(L, row_bytes=tm1 * in_bytes * 2, budget=budget, cap=lane_cap)
    num_mb1 = -(-NC // tm1)
    num_lb1 = -(-L // tl1)
    nc_pad = num_mb1 * tm1   # pad stats outputs so no output block is partial

    s1, s2, shift = pl.pallas_call(
        functools.partial(_stats_kernel, tl=tl1, L=L, num_lb=num_lb1),
        out_shape=(
            jax.ShapeDtypeStruct((nc_pad, 1), jnp.float32),
            jax.ShapeDtypeStruct((nc_pad, 1), jnp.float32),
            jax.ShapeDtypeStruct((nc_pad, 1), jnp.float32),
        ),
        grid=(num_mb1, num_lb1),
        in_specs=[pl.BlockSpec((tm1, tl1), lambda mi, li: (mi, li))],
        out_specs=(
            pl.BlockSpec((tm1, 1), lambda mi, li: (mi, 0)),
            pl.BlockSpec((tm1, 1), lambda mi, li: (mi, 0)),
            pl.BlockSpec((tm1, 1), lambda mi, li: (mi, 0)),
        ),
        compiler_params=pltpu.CompilerParams(
            dimension_semantics=("parallel", "arbitrary"),
            vmem_limit_bytes=vmem_limit),
    )(x2)

    # -------- Tiny O(N*C) combine (plain JAX): Chan merge of per-row stats --------
    s1 = s1[:NC].reshape(N, C)
    s2 = s2[:NC].reshape(N, C)
    shift = shift[:NC].reshape(N, C)
    inv_l = 1.0 / L
    mean_r = shift + s1 * inv_l
    m2_r = jnp.maximum(s2 - s1 * s1 * inv_l, 0.0)

    mean_c = jnp.mean(mean_r, axis=0, keepdims=True)                       # (1, C)
    m2_c = (jnp.sum(m2_r, axis=0, keepdims=True)
            + L * jnp.sum((mean_r - mean_c) ** 2, axis=0, keepdims=True))
    rinv_c = jax.lax.rsqrt(m2_c / (N * L) + eps)
    mean_n = jnp.mean(mean_r, axis=1, keepdims=True)                       # (N, 1)
    m2_n = (jnp.sum(m2_r, axis=1, keepdims=True)
            + L * jnp.sum((mean_r - mean_n) ** 2, axis=1, keepdims=True))
    rinv_n = jax.lax.rsqrt(m2_n / (C * L) + eps)

    b = bcn_var.astype(jnp.float32).reshape(1, C)
    g = gamma.astype(jnp.float32).reshape(1, C)
    be = beta.astype(jnp.float32).reshape(1, C)

    # out = g*(b*(x-mean_c)*rinv_c + (1-b)*(x-mean_n)*rinv_n) + be = x*scale + offset
    scale = (g * (b * rinv_c + (1.0 - b) * rinv_n)).reshape(NC, 1)
    offset = (be - g * (b * rinv_c * mean_c
                        + (1.0 - b) * rinv_n * mean_n)).reshape(NC, 1)

    # ------------- Pass 2: fused per-element FMA (one read + one write) -------------
    tm2 = NC if NC <= 2 * _ROW_TILE_CAP else _ROW_TILE_CAP
    tl2 = _pick_lane_tile(L, row_bytes=tm2 * in_bytes * 4, budget=budget, cap=lane_cap)
    num_mb2 = -(-NC // tm2)
    num_lb2 = -(-L // tl2)

    out = pl.pallas_call(
        _apply_kernel,
        out_shape=jax.ShapeDtypeStruct((NC, L), x.dtype),
        grid=(num_mb2, num_lb2),
        in_specs=[
            pl.BlockSpec((tm2, tl2), lambda mi, li: (mi, li)),
            pl.BlockSpec((tm2, 1), lambda mi, li: (mi, 0)),
            pl.BlockSpec((tm2, 1), lambda mi, li: (mi, 0)),
        ],
        out_specs=pl.BlockSpec((tm2, tl2), lambda mi, li: (mi, li)),
        compiler_params=pltpu.CompilerParams(
            dimension_semantics=("parallel", "parallel"),
            vmem_limit_bytes=vmem_limit),
    )(x2, scale, offset)
    return out.reshape(N, C, H, W)


@functools.partial(jax.jit, static_argnames=("eps", "force_two_pass", "max_lane_tile"))
def batch_channel_norm(x, bcn_var, gamma, beta, eps=1e-5,
                       force_two_pass=False, max_lane_tile=None):
    """x: (N, C, H, W) NCHW. bcn_var/gamma/beta: (C,). BatchChannelNorm forward."""
    N, C, H, W = x.shape
    L = H * W
    vmem_limit = _vmem_limit_bytes()
    lane_cap = max(_LANE, min(_MAX_LANE_TILE, max_lane_tile or _MAX_LANE_TILE))

    # Small/medium tensors: single fused kernel (x resident in VMEM) -> 2x HBM
    # traffic instead of 3x. Generation-aware threshold (v7x has half the VMEM).
    fused_fits = (N * C * L * 4) * 6 <= vmem_limit
    if fused_fits and not force_two_pass:
        return _fused(x, bcn_var, gamma, beta, eps, vmem_limit)
    return _two_pass(x, bcn_var, gamma, beta, eps, vmem_limit, lane_cap)


def _reference(x, bcn_var, gamma, beta, eps=1e-5):
    # Pure-JAX reference mirroring the PyTorch forward (training mode).
    mean_c = jnp.mean(x, axis=(0, 2, 3), keepdims=True)
    var_c = jnp.mean((x - mean_c) ** 2, axis=(0, 2, 3), keepdims=True)
    X = (x - mean_c) / jnp.sqrt(var_c + eps)
    mean_b = jnp.mean(x, axis=(1, 2, 3), keepdims=True)
    var_b = jnp.mean((x - mean_b) ** 2, axis=(1, 2, 3), keepdims=True)
    Y = (x - mean_b) / jnp.sqrt(var_b + eps)
    b = bcn_var.reshape(1, -1, 1, 1)
    out = b * X + (1.0 - b) * Y
    return gamma.reshape(1, -1, 1, 1) * out + beta.reshape(1, -1, 1, 1)


if __name__ == "__main__":
    key = jax.random.PRNGKey(0)
    k0, k1, k2, k3, k4, k5 = jax.random.split(key, 6)

    # --- Test 1: module-default params (BCN_var=1, gamma=1, beta=0); fused path ---
    N, C, H, W = 2, 4, 16, 16
    x = jax.random.normal(k0, (N, C, H, W), dtype=jnp.float32)
    bcn_var = jnp.ones((C,), jnp.float32)
    gamma = jnp.ones((C,), jnp.float32)
    beta = jnp.zeros((C,), jnp.float32)

    out = jax.block_until_ready(batch_channel_norm(x, bcn_var, gamma, beta))
    ref = _reference(x, bcn_var, gamma, beta)
    assert out.shape == (N, C, H, W)
    assert jnp.allclose(out, ref, rtol=1e-4, atol=1e-4), "mismatch vs reference (test 1)"

    # --- Test 2: random params, L not a multiple of 128, non-zero mean; run both
    #     the fused path and the two-pass path (tail-masked, multi-L-block). ---
    N2, C2, H2, W2 = 2, 8, 24, 24
    x2 = jax.random.normal(k1, (N2, C2, H2, W2), dtype=jnp.float32) + 3.0
    bcn2 = jax.random.uniform(k2, (C2,), jnp.float32)
    gamma2 = jax.random.normal(k3, (C2,), jnp.float32)
    beta2 = jax.random.normal(k4, (C2,), jnp.float32)
    ref2 = _reference(x2, bcn2, gamma2, beta2)

    out2_fused = jax.block_until_ready(batch_channel_norm(x2, bcn2, gamma2, beta2))
    out2_2pass = jax.block_until_ready(
        batch_channel_norm(x2, bcn2, gamma2, beta2,
                           force_two_pass=True, max_lane_tile=128))
    assert jnp.allclose(out2_fused, ref2, rtol=1e-4, atol=1e-4), "mismatch (test 2 fused)"
    assert jnp.allclose(out2_2pass, ref2, rtol=1e-4, atol=1e-4), "mismatch (test 2 two-pass)"

    # --- Test 3: N*C > row-tile cap -> partial row block in Pass 1 + multi L blocks ---
    N3, C3, H3, W3 = 3, 96, 16, 24
    x3 = jax.random.normal(k5, (N3, C3, H3, W3), dtype=jnp.float32) * 0.5 + 1.0
    bcn3 = jnp.full((C3,), 0.3, jnp.float32)
    gamma3 = jnp.full((C3,), 1.5, jnp.float32)
    beta3 = jnp.full((C3,), -0.25, jnp.float32)
    out3 = jax.block_until_ready(
        batch_channel_norm(x3, bcn3, gamma3, beta3,
                           force_two_pass=True, max_lane_tile=128))
    ref3 = _reference(x3, bcn3, gamma3, beta3)
    assert jnp.allclose(out3, ref3, rtol=1e-4, atol=1e-4), "mismatch vs reference (test 3)"

    print("KERNEL_OK")
</pallas_src>

<mosaic_0001>
module attributes {stable_mosaic.version = 11 : i64} {
  func.func @_fused_kernel(%arg0: i32, %arg1: memref<2x4x256xf32, #tpu.memory_space<vmem>>, %arg2: memref<4x1xf32, #tpu.memory_space<vmem>>, %arg3: memref<4x1xf32, #tpu.memory_space<vmem>>, %arg4: memref<4x1xf32, #tpu.memory_space<vmem>>, %arg5: memref<2x4x256xf32, #tpu.memory_space<vmem>>) attributes {dimension_semantics = [#tpu.dimension_semantics<arbitrary>], iteration_bounds = array<i64: 1>, scalar_prefetch = 0 : i64, scratch_operands = 0 : i64, tpu.core_type = #tpu.core_type<tc>, window_params = [{pipeline_mode = #tpu.pipeline_mode<synchronous>, transform_indices = @transform_0, window_bounds = array<i64: 2, 4, 256>}, {pipeline_mode = #tpu.pipeline_mode<synchronous>, transform_indices = @transform_1, window_bounds = array<i64: 4, 1>}, {pipeline_mode = #tpu.pipeline_mode<synchronous>, transform_indices = @transform_2, window_bounds = array<i64: 4, 1>}, {pipeline_mode = #tpu.pipeline_mode<synchronous>, transform_indices = @transform_3, window_bounds = array<i64: 4, 1>}, {pipeline_mode = #tpu.pipeline_mode<synchronous>, transform_indices = @transform_4, window_bounds = array<i64: 2, 4, 256>}]} {
    %c0 = arith.constant 0 : index
    %c0_0 = arith.constant 0 : index
    %c0_1 = arith.constant 0 : index
    %0 = vector.load %arg1[%c0, %c0_0, %c0_1] : memref<2x4x256xf32, #tpu.memory_space<vmem>>, vector<2x4x256xf32>
    %1 = vector.extract_strided_slice %0 {offsets = [0, 0, 0], sizes = [2, 4, 1], strides = [1, 1, 1]} : vector<2x4x256xf32> to vector<2x4x1xf32>
    %2 = vector.broadcast %1 : vector<2x4x1xf32> to vector<2x4x256xf32>
    %3 = arith.subf %0, %2 : vector<2x4x256xf32>
    %cst = arith.constant dense<0.000000e+00> : vector<2x4xf32>
    %4 = vector.multi_reduction <add>, %3, %cst [2] : vector<2x4x256xf32> to vector<2x4xf32>
    %5 = vector.shape_cast %4 : vector<2x4xf32> to vector<2x4x1xf32>
    %6 = arith.mulf %3, %3 : vector<2x4x256xf32>
    %cst_2 = arith.constant dense<0.000000e+00> : vector<2x4xf32>
    %7 = vector.multi_reduction <add>, %6, %cst_2 [2] : vector<2x4x256xf32> to vector<2x4xf32>
    %8 = vector.shape_cast %7 : vector<2x4xf32> to vector<2x4x1xf32>
    %cst_3 = arith.constant 3.906250e-03 : f32
    %9 = vector.broadcast %cst_3 : f32 to vector<2x4x1xf32>
    %10 = arith.mulf %5, %9 : vector<2x4x1xf32>
    %11 = arith.addf %1, %10 : vector<2x4x1xf32>
    %12 = arith.mulf %5, %5 : vector<2x4x1xf32>
    %cst_4 = arith.constant 3.906250e-03 : f32
    %13 = vector.broadcast %cst_4 : f32 to vector<2x4x1xf32>
    %14 = arith.mulf %12, %13 : vector<2x4x1xf32>
    %15 = arith.subf %8, %14 : vector<2x4x1xf32>
    %cst_5 = arith.constant 0.000000e+00 : f32
    %16 = vector.broadcast %cst_5 : f32 to vector<2x4x1xf32>
    %17 = arith.maximumf %15, %16 : vector<2x4x1xf32>
    %cst_6 = arith.constant dense<0.000000e+00> : vector<4x1xf32>
    %18 = vector.multi_reduction <add>, %11, %cst_6 [0] : vector<2x4x1xf32> to vector<4x1xf32>
    %19 = vector.shape_cast %18 : vector<4x1xf32> to vector<1x4x1xf32>
    %cst_7 = arith.constant 2.000000e+00 : f32
    %20 = vector.broadcast %cst_7 : f32 to vector<1x4x1xf32>
    %21 = arith.divf %19, %20 : vector<1x4x1xf32>
    %cst_8 = arith.constant dense<0.000000e+00> : vector<4x1xf32>
    %22 = vector.multi_reduction <add>, %17, %cst_8 [0] : vector<2x4x1xf32> to vector<4x1xf32>
    %23 = vector.shape_cast %22 : vector<4x1xf32> to vector<1x4x1xf32>
    %24 = vector.broadcast %21 : vector<1x4x1xf32> to vector<2x4x1xf32>
    %25 = arith.subf %11, %24 : vector<2x4x1xf32>
    %26 = arith.mulf %25, %25 : vector<2x4x1xf32>
    %cst_9 = arith.constant dense<0.000000e+00> : vector<4x1xf32>
    %27 = vector.multi_reduction <add>, %26, %cst_9 [0] : vector<2x4x1xf32> to vector<4x1xf32>
    %28 = vector.shape_cast %27 : vector<4x1xf32> to vector<1x4x1xf32>
    %cst_10 = arith.constant 2.560000e+02 : f32
    %29 = vector.broadcast %cst_10 : f32 to vector<1x4x1xf32>
    %30 = arith.mulf %29, %28 : vector<1x4x1xf32>
    %31 = arith.addf %23, %30 : vector<1x4x1xf32>
    %cst_11 = arith.constant 5.120000e+02 : f32
    %32 = vector.broadcast %cst_11 : f32 to vector<1x4x1xf32>
    %33 = arith.divf %31, %32 : vector<1x4x1xf32>
    %cst_12 = arith.constant 9.99999974E-6 : f32
    %34 = vector.broadcast %cst_12 : f32 to vector<1x4x1xf32>
    %35 = arith.addf %33, %34 : vector<1x4x1xf32>
    %36 = math.rsqrt %35 : vector<1x4x1xf32>
    %cst_13 = arith.constant dense<0.000000e+00> : vector<2x1xf32>
    %37 = vector.multi_reduction <add>, %11, %cst_13 [1] : vector<2x4x1xf32> to vector<2x1xf32>
    %38 = vector.shape_cast %37 : vector<2x1xf32> to vector<2x1x1xf32>
    %cst_14 = arith.constant 4.000000e+00 : f32
    %39 = vector.broadcast %cst_14 : f32 to vector<2x1x1xf32>
    %40 = arith.divf %38, %39 : vector<2x1x1xf32>
    %cst_15 = arith.constant dense<0.000000e+00> : vector<2x1xf32>
    %41 = vector.multi_reduction <add>, %17, %cst_15 [1] : vector<2x4x1xf32> to vector<2x1xf32>
    %42 = vector.shape_cast %41 : vector<2x1xf32> to vector<2x1x1xf32>
    %43 = vector.broadcast %40 : vector<2x1x1xf32> to vector<2x4x1xf32>
    %44 = arith.subf %11, %43 : vector<2x4x1xf32>
    %45 = arith.mulf %44, %44 : vector<2x4x1xf32>
    %cst_16 = arith.constant dense<0.000000e+00> : vector<2x1xf32>
    %46 = vector.multi_reduction <add>, %45, %cst_16 [1] : vector<2x4x1xf32> to vector<2x1xf32>
    %47 = vector.shape_cast %46 : vector<2x1xf32> to vector<2x1x1xf32>
    %cst_17 = arith.constant 2.560000e+02 : f32
    %48 = vector.broadcast %cst_17 : f32 to vector<2x1x1xf32>
    %49 = arith.mulf %48, %47 : vector<2x1x1xf32>
    %50 = arith.addf %42, %49 : vector<2x1x1xf32>
    %cst_18 = arith.constant 1.024000e+03 : f32
    %51 = vector.broadcast %cst_18 : f32 to vector<2x1x1xf32>
    %52 = arith.divf %50, %51 : vector<2x1x1xf32>
    %cst_19 = arith.constant 9.99999974E-6 : f32
    %53 = vector.broadcast %cst_19 : f32 to vector<2x1x1xf32>
    %54 = arith.addf %52, %53 : vector<2x1x1xf32>
    %55 = math.rsqrt %54 : vector<2x1x1xf32>
    %c0_20 = arith.constant 0 : index
    %c0_21 = arith.constant 0 : index
    %56 = vector.load %arg2[%c0_20, %c0_21] : memref<4x1xf32, #tpu.memory_space<vmem>>, vector<4x1xf32>
    %57 = vector.shape_cast %56 : vector<4x1xf32> to vector<1x4x1xf32>
    %c0_22 = arith.constant 0 : index
    %c0_23 = arith.constant 0 : index
    %58 = vector.load %arg3[%c0_22, %c0_23] : memref<4x1xf32, #tpu.memory_space<vmem>>, vector<4x1xf32>
    %59 = vector.shape_cast %58 : vector<4x1xf32> to vector<1x4x1xf32>
    %c0_24 = arith.constant 0 : index
    %c0_25 = arith.constant 0 : index
    %60 = vector.load %arg4[%c0_24, %c0_25] : memref<4x1xf32, #tpu.memory_space<vmem>>, vector<4x1xf32>
    %61 = vector.shape_cast %60 : vector<4x1xf32> to vector<1x4x1xf32>
    %62 = arith.mulf %57, %36 : vector<1x4x1xf32>
    %cst_26 = arith.constant 1.000000e+00 : f32
    %63 = vector.broadcast %cst_26 : f32 to vector<1x4x1xf32>
    %64 = arith.subf %63, %57 : vector<1x4x1xf32>
    %65 = vector.broadcast %64 : vector<1x4x1xf32> to vector<2x4x1xf32>
    %66 = vector.broadcast %55 : vector<2x1x1xf32> to vector<2x4x1xf32>
    %67 = arith.mulf %65, %66 : vector<2x4x1xf32>
    %68 = vector.broadcast %62 : vector<1x4x1xf32> to vector<2x4x1xf32>
    %69 = arith.addf %68, %67 : vector<2x4x1xf32>
    %70 = vector.broadcast %59 : vector<1x4x1xf32> to vector<2x4x1xf32>
    %71 = arith.mulf %70, %69 : vector<2x4x1xf32>
    %72 = arith.mulf %57, %36 : vector<1x4x1xf32>
    %73 = arith.mulf %72, %21 : vector<1x4x1xf32>
    %cst_27 = arith.constant 1.000000e+00 : f32
    %74 = vector.broadcast %cst_27 : f32 to vector<1x4x1xf32>
    %75 = arith.subf %74, %57 : vector<1x4x1xf32>
    %76 = vector.broadcast %75 : vector<1x4x1xf32> to vector<2x4x1xf32>
    %77 = vector.broadcast %55 : vector<2x1x1xf32> to vector<2x4x1xf32>
    %78 = arith.mulf %76, %77 : vector<2x4x1xf32>
    %79 = vector.broadcast %40 : vector<2x1x1xf32> to vector<2x4x1xf32>
    %80 = arith.mulf %78, %79 : vector<2x4x1xf32>
    %81 = vector.broadcast %73 : vector<1x4x1xf32> to vector<2x4x1xf32>
    %82 = arith.addf %81, %80 : vector<2x4x1xf32>
    %83 = vector.broadcast %59 : vector<1x4x1xf32> to vector<2x4x1xf32>
    %84 = arith.mulf %83, %82 : vector<2x4x1xf32>
    %85 = vector.broadcast %61 : vector<1x4x1xf32> to vector<2x4x1xf32>
    %86 = arith.subf %85, %84 : vector<2x4x1xf32>
    %87 = vector.broadcast %71 : vector<2x4x1xf32> to vector<2x4x256xf32>
    %88 = arith.mulf %0, %87 : vector<2x4x256xf32>
    %89 = vector.broadcast %86 : vector<2x4x1xf32> to vector<2x4x256xf32>
    %90 = arith.addf %88, %89 : vector<2x4x256xf32>
    %c0_28 = arith.constant 0 : index
    %c0_29 = arith.constant 0 : index
    %c0_30 = arith.constant 0 : index
    %91 = vector.load %arg5[%c0_28, %c0_29, %c0_30] : memref<2x4x256xf32, #tpu.memory_space<vmem>>, vector<2x4x256xf32>
    tpu.vector_store %arg5[%c0_28, %c0_29, %c0_30], %90 {strides = array<i32>} : memref<2x4x256xf32, #tpu.memory_space<vmem>>, vector<2x4x256xf32>,
    return
  }
  func.func @transform_0(%arg0: i32) -> (i32, i32, i32) {
    %c0_i32 = arith.constant 0 : i32
    %c0_i32_0 = arith.constant 0 : i32
    %c0_i32_1 = arith.constant 0 : i32
    %c0_i32_2 = arith.constant 0 : i32
    return %c0_i32, %c0_i32_0, %c0_i32_1 : i32, i32, i32
  }
  func.func @transform_1(%arg0: i32) -> (i32, i32) {
    %c0_i32 = arith.constant 0 : i32
    %c0_i32_0 = arith.constant 0 : i32
    %c0_i32_1 = arith.constant 0 : i32
    return %c0_i32, %c0_i32_0 : i32, i32
  }
  func.func @transform_2(%arg0: i32) -> (i32, i32) {
    %c0_i32 = arith.constant 0 : i32
    %c0_i32_0 = arith.constant 0 : i32
    %c0_i32_1 = arith.constant 0 : i32
    return %c0_i32, %c0_i32_0 : i32, i32
  }
  func.func @transform_3(%arg0: i32) -> (i32, i32) {
    %c0_i32 = arith.constant 0 : i32
    %c0_i32_0 = arith.constant 0 : i32
    %c0_i32_1 = arith.constant 0 : i32
    return %c0_i32, %c0_i32_0 : i32, i32
  }
  func.func @transform_4(%arg0: i32) -> (i32, i32, i32) {
    %c0_i32 = arith.constant 0 : i32
    %c0_i32_0 = arith.constant 0 : i32
    %c0_i32_1 = arith.constant 0 : i32
    %c0_i32_2 = arith.constant 0 : i32
    return %c0_i32, %c0_i32_0, %c0_i32_1 : i32, i32, i32
  }
}

</mosaic_0001>

<bundles_post_ra>
// kernel: batch_channel_norm.1
= control target key start
LH: loop header
LB: loop body
LE: loop exit
PB: predicated region body
PF: predicated region fallthrough
CT: control target
= control target key end

     0   :  { %v258_v0 = vmov 0   ;;  %v259_v3 = vmov 839922192   ;;  %v27_v5 = vlaneseq  ;;  %vm51_vm0 = vcmask 1043456   ;;  %s351_s0 = inlined_call_operand.vmem [shape: f32[2,4,256], index: 0, kind: input, shape index: {}]   ;;  %s352_s1 = inlined_call_operand.vmem [shape: f32[4,1], index: 1, kind: input, shape index: {}]   ;;  %s353_s2 = inlined_call_operand.vmem [shape: f32[4,1], index: 2, kind: input, shape index: {}]   ;;  %s354_s3 = inlined_call_operand.vmem [shape: f32[4,1], index: 3, kind: input, shape index: {}]   ;;  %s355_s4 = inlined_call_operand.vmem [shape: f32[2,4,256], index: 4, kind: output, shape index: {}]  }
   0x1   :  { %250 = vset.pattern.permute.xlu0 %v258_v0  ;;  %v288_v1 = vld [vmem:[%s351_s0] sm:$0xff]  ;;  %251 = vset.pattern.permute.xlu1 %v258_v0  ;;  %v294_v2 = vld [vmem:[%s351_s0 + $0x8] sm:$0xff]  ;;  %v25_v4 = vunpack.c.l.s4 %v259_v3  ;;  %vm92_vm1 = vcmask 3072  }
   0x2   :  { %21 = vperm.xlu0 %250, %v288_v1   ;;  %v28_v7 = vshrl.u32 %v27_v5, 7 }
   0x3   :  { %v26_v6 = vunpack.c.0.s8 %v25_v4 }
   0x5   :  { %v297_v8 = vsub.s32 %v26_v6, %v28_v7 }
   0x6   :  { %33 = vperm.xlu0 %250, %v294_v2  }
  0x81   :  { %v22_v9 = vpop.permute.xlu0 %21 }
  0x82   :  { %v30_v10 = vrot.slane %v22_v9, %v297_v8 }
  0x84   :  { %v43_v11 = vsub.f32 %v288_v1, %v30_v10 }
  0x85   :  { %v34_v12 = vpop.permute.xlu0 %33 }
  0x86   :  { %v42_v13 = vrot.slane %v34_v12, %v297_v8  ;;  %v47_v14 = vcombine.high %v43_v11, %v43_v11  ;;  %v62_v15 = vmul.f32 %v43_v11, %v43_v11  ;;  %v52_v17 = vsel %vm51_vm0, %v43_v11, 0.0 }
  0x88   :  { %v44_v16 = vsub.f32 %v294_v2, %v42_v13  ;;  %v53_v18 = vsel %vm51_vm0, %v47_v14, 0.0  ;;  %v66_v19 = vcombine.high %v62_v15, %v62_v15  ;;  %v70_v21 = vsel %vm51_vm0, %v62_v15, 0.0 }
  0x89   :  { %v54_v20 = vadd.f32 %v53_v18, %v52_v17 }
  0x8a   :  { %v71_v22 = vsel %vm51_vm0, %v66_v19, 0.0  ;;  %v48_v23 = vcombine.high %v44_v16, %v44_v16  ;;  %v63_v24 = vmul.f32 %v44_v16, %v44_v16  ;;  %v57_v26 = vsel %vm51_vm0, %v44_v16, 0.0 }
  0x8b   :  { %55 = vadd.xlane.f32.xlu1 %v54_v20  ;;  %v72_v25 = vadd.f32 %v71_v22, %v70_v21 }
  0x8c   :  { %v58_v27 = vsel %vm51_vm0, %v48_v23, 0.0  ;;  %v67_v28 = vcombine.high %v63_v24, %v63_v24  ;;  %v75_v31 = vsel %vm51_vm0, %v63_v24, 0.0 }
  0x8d   :  { %73 = vadd.xlane.f32.xlu0 %v72_v25  ;;  %v59_v29 = vadd.f32 %v58_v27, %v57_v26 }
  0x8e   :  { %v76_v30 = vsel %vm51_vm0, %v67_v28, 0.0 }
  0x8f   :  { %60 = vadd.xlane.f32.xlu1 %v59_v29  ;;  %v77_v32 = vadd.f32 %v76_v30, %v75_v31 }
  0x93   :  { %78 = vadd.xlane.f32.xlu1 %v77_v32 }
 0x118   :  { %v56_v33 = vpop.xlane.xlu1 %55 }
 0x119   :  { %v80_v34 = vmul.f32 0.00390625, %v56_v33  ;;  %v84_v35 = vmul.f32 %v56_v33, %v56_v33 }
 0x11a   :  { %v74_v38 = vpop.xlane.xlu0 %73 }
 0x11b   :  { %v82_v36 = vadd.f32 %v80_v34, %v288_v1  ;;  %v86_v37 = vmul.f32 0.00390625, %v84_v35 }
 0x11c   :  { %v61_v39 = vpop.xlane.xlu1 %60 }
 0x11d   :  { %v93_v40 = vsel %vm92_vm1, %v82_v36, 0.0  ;;  %v88_v41 = vsub.f32 %v74_v38, %v86_v37  ;;  %v81_v42 = vmul.f32 0.00390625, %v61_v39  ;;  %v85_v43 = vmul.f32 %v61_v39, %v61_v39 }
 0x11e   :  { %v114_v44 = vrot.slane %v93_v40, 4 }
 0x11f   :  { %v83_v45 = vadd.f32 %v81_v42, %v294_v2  ;;  %v87_v46 = vmul.f32 0.00390625, %v85_v43  ;;  %v90_v49 = vmax.f32 %v88_v41, 0.0 }
 0x120   :  { %v115_v47 = vadd.f32 %v114_v44, %v93_v40  ;;  %v79_v48 = vpop.xlane.xlu1 %78 }
 0x121   :  { %v94_v50 = vsel %vm92_vm1, %v83_v45, 0.0  ;;  %v89_v54 = vsub.f32 %v79_v48, %v87_v46  ;;  %v98_v58 = vsel %vm51_vm0, %v90_v49, 0.0 }
 0x122   :  { %v116_v51 = vrot.slane %v115_v47, 2  ;;  %v95_v52 = vadd.f32 %v94_v50, %v93_v40  ;;  %v120_v53 = vrot.slane %v94_v50, 4  ;;  %v129_v3 = vrot.slane %v98_v58, 4 }
 0x123   :  { %v91_v62 = vmax.f32 %v89_v54, 0.0 }
 0x124   :  { %v117_v55 = vadd.f32 %v116_v51, %v115_v47  ;;  %v315_v56 = vmul.f32 0.5, %v95_v52  ;;  %v121_v57 = vadd.f32 %v120_v53, %v94_v50  ;;  %v130_v14 = vadd.f32 %v129_v3, %v98_v58  ;;  %v171_v3 = vld [vmem:[%s353_s2] sm:$0xf] }
 0x125   :  { %v99_v11 = vsel %vm51_vm0, %v91_v62, 0.0 }
 0x126   :  { %v118_v59 = vrot.slane %v117_v55, 1  ;;  %v102_v60 = vsub.f32 %v83_v45, %v315_v56  ;;  %v122_v61 = vrot.slane %v121_v57, 2  ;;  %v101_v63 = vsub.f32 %v82_v36, %v315_v56 }
 0x127   :  { %v135_v17 = vrot.slane %v99_v11, 4  ;;  %v131_v21 = vrot.slane %v130_v14, 2  ;;  %v100_v28 = vadd.f32 %v99_v11, %v98_v58 }
 0x128   :  { %v119_v0 = vadd.f32 %v118_v59, %v117_v55  ;;  %v104_v4 = vmul.f32 %v102_v60, %v102_v60  ;;  %v123_v5 = vadd.f32 %v122_v61, %v121_v57  ;;  %v103_v6 = vmul.f32 %v101_v63, %v101_v63  ;;  %v170_v60 = vld [vmem:[%s352_s1] sm:$0xf] }
 0x129   :  { %v136_v25 = vadd.f32 %v135_v17, %v99_v11  ;;  %v132_v29 = vadd.f32 %v131_v21, %v130_v14  ;;  %v174_v61 = vsub.f32 1.0, %v170_v60 }
 0x12a   :  { %v320_v7 = vmul.f32 0.25, %v119_v0  ;;  %v124_v9 = vrot.slane %v123_v5, 1  ;;  %v106_v10 = vsel %vm92_vm1, %v104_v4, 0.0  ;;  %v105_v12 = vsel %vm92_vm1, %v103_v6, 0.0 }
 0x12b   :  { %v107_v16 = vadd.f32 %v106_v10, %v105_v12  ;;  %v137_v34 = vrot.slane %v136_v25, 2  ;;  %v133_v37 = vrot.slane %v132_v29, 1 }
 0x12c   :  { %v141_v13 = vsub.f32 %v82_v36, %v320_v7  ;;  %v125_v15 = vadd.f32 %v124_v9, %v123_v5 }
 0x12d   :  { %v108_v24 = vmul.f32 256.0, %v107_v16  ;;  %v138_v41 = vadd.f32 %v137_v34, %v136_v25  ;;  %v134_v44 = vadd.f32 %v133_v37, %v132_v29 }
 0x12e   :  { %v143_v18 = vmul.f32 %v141_v13, %v141_v13  ;;  %v128_v19 = vmul.f32 0.25, %v125_v15 }
 0x12f   :  { %v109_v33 = vadd.f32 %v108_v24, %v100_v28  ;;  %v139_v48 = vrot.slane %v138_v41, 1 }
 0x130   :  { %v145_v20 = vsel %vm92_vm1, %v143_v18, 0.0  ;;  %v142_v22 = vsub.f32 %v83_v45, %v128_v19  ;;  %v172_v18 = vld [vmem:[%s354_s3] sm:$0xf] }
 0x131   :  { %v146_v23 = vrot.slane %v145_v20, 4  ;;  %v111_v40 = vmul.f32 0.001953125, %v109_v33  ;;  %v140_v53 = vadd.f32 %v139_v48, %v138_v41 }
 0x132   :  { %v144_v26 = vmul.f32 %v142_v22, %v142_v22 }
 0x133   :  { %v147_v27 = vadd.f32 %v146_v23, %v145_v20  ;;  %v112_v47 = vadd.f32 1e-05, %v111_v40 }
 0x134   :  { %v152_v30 = vsel %vm92_vm1, %v144_v26, 0.0 }
 0x135   :  { %v148_v31 = vrot.slane %v147_v27, 2  ;;  %v153_v32 = vrot.slane %v152_v30, 4  ;;  %252 = vrsqrt.f32 %v112_v47 }
 0x137   :  { %v149_v35 = vadd.f32 %v148_v31, %v147_v27  ;;  %v154_v36 = vadd.f32 %v153_v32, %v152_v30 }
 0x139   :  { %v150_v38 = vrot.slane %v149_v35, 1  ;;  %v155_v39 = vrot.slane %v154_v36, 2 }
 0x13b   :  { %v151_v42 = vadd.f32 %v150_v38, %v149_v35  ;;  %v156_v43 = vadd.f32 %v155_v39, %v154_v36 }
 0x13d   :  { %v159_v45 = vmul.f32 256.0, %v151_v42  ;;  %v157_v46 = vrot.slane %v156_v43, 1 }
 0x13f   :  { %v161_v49 = vadd.f32 %v159_v45, %v134_v44  ;;  %v158_v50 = vadd.f32 %v157_v46, %v156_v43  ;;  %v253_v59 = vpop.eup %252 }
 0x140   :  { %v173_v62 = vmul.f32 %v253_v59, %v170_v60 }
 0x141   :  { %v164_v51 = vmul.f32 0.0009765625, %v161_v49  ;;  %v160_v52 = vmul.f32 256.0, %v158_v50 }
 0x142   :  { %v181_v5 = vmul.f32 %v173_v62, %v315_v56 }
 0x143   :  { %v166_v54 = vadd.f32 1e-05, %v164_v51  ;;  %v162_v55 = vadd.f32 %v160_v52, %v140_v53 }
 0x145   :  { %254 = vrsqrt.f32 %v166_v54  ;;  %v165_v57 = vmul.f32 0.0009765625, %v162_v55 }
 0x147   :  { %v167_v58 = vadd.f32 1e-05, %v165_v57 }
 0x149   :  { %256 = vrsqrt.f32 %v167_v58 }
 0x14f   :  { %v255_v63 = vpop.eup %254 }
 0x150   :  { %v175_v0 = vmul.f32 %v255_v63, %v174_v61 }
 0x152   :  { %v177_v4 = vadd.f32 %v175_v0, %v173_v62  ;;  %v182_v6 = vmul.f32 %v175_v0, %v320_v7 }
 0x153   :  { %v257_v9 = vpop.eup %256 }
 0x154   :  { %v179_v10 = vmul.f32 %v177_v4, %v171_v3  ;;  %v176_v11 = vmul.f32 %v257_v9, %v174_v61  ;;  %v184_v12 = vadd.f32 %v182_v6, %v181_v5 }
 0x156   :  { %192 = vperm.xlu1 %251, %v179_v10   ;;  %v178_v13 = vadd.f32 %v176_v11, %v173_v62  ;;  %v183_v14 = vmul.f32 %v176_v11, %v128_v19  ;;  %v186_v16 = vmul.f32 %v184_v12, %v171_v3 }
 0x158   :  { %v180_v15 = vmul.f32 %v178_v13, %v171_v3  ;;  %v185_v17 = vadd.f32 %v183_v14, %v181_v5  ;;  %v188_v20 = vsub.f32 %v172_v18, %v186_v16 }
 0x15a   :  { %196 = vperm.xlu1 %251, %v180_v15   ;;  %v187_v21 = vmul.f32 %v185_v17, %v171_v3 }
 0x15c   :  { %v189_v56 = vsub.f32 %v172_v18, %v187_v21 }
 0x15e   :  { %218 = vperm.xlu1 %251, %v188_v20  }
 0x162   :  { %222 = vperm.xlu1 %251, %v189_v56  }
 0x1d5   :  { %v193_v7 = vpop.permute.xlu1 %192 }
 0x1d6   :  { %v204_v23 = vrot.slane %v193_v7, %v297_v8 }
 0x1d8   :  { %v214_v19 = vmul.f32 %v204_v23, %v288_v1 }
 0x1d9   :  { %v197_v22 = vpop.permute.xlu1 %196 }
 0x1da   :  { %v211_v25 = vrot.slane %v197_v22, %v297_v8 }
 0x1dc   :  { %v215_v29 = vmul.f32 %v211_v25, %v294_v2 }
 0x1dd   :  { %v219_v24 = vpop.permute.xlu1 %218 }
 0x1de   :  { %v230_v26 = vrot.slane %v219_v24, %v297_v8 }
 0x1e0   :  { %v240_v27 = vadd.f32 %v230_v26, %v214_v19 }
 0x1e1   :  { %v223_v28 = vpop.permute.xlu1 %222 }
 0x1e2   :  { %242 = vst [vmem:[%s355_s4] sm:$0xff] %v240_v27  ;;  %v237_v30 = vrot.slane %v223_v28, %v297_v8 }
 0x1e4   :  { %v241_v31 = vadd.f32 %v237_v30, %v215_v29 }
 0x1e6   :  { %243 = vst [vmem:[%s355_s4 + $0x8] sm:$0xff] %v241_v31 }

</bundles_post_ra>
